<compile_context>
chip_gen: v5e
topology: v5e:2x2
jax: 0.10.0
libtpu: 0.0.40
codegen_flags: <defaults>
</compile_context>

<pallas_src>
import jax
import jax.numpy as jnp
from jax.experimental import pallas as pl
from jax.experimental.pallas import tpu as pltpu


def mlp_embedding_kernel(x_ref, w1_ref, b1_ref, w2_ref, b2_ref, w3_ref, o_ref):
    # Layer 1: Linear (BN scale pre-folded into w1) + shift + ReLU
    h = jnp.dot(x_ref[...], w1_ref[...], preferred_element_type=jnp.float32)
    h = jnp.maximum(h + b1_ref[...], 0.0)
    # Layer 2: Linear (BN scale pre-folded into w2) + shift + ReLU
    h = jnp.dot(h, w2_ref[...], preferred_element_type=jnp.float32)
    h = jnp.maximum(h + b2_ref[...], 0.0)
    # Output projection: Linear, no bias, no activation
    e = jnp.dot(h, w3_ref[...], preferred_element_type=jnp.float32)
    # Norm(ord=2): x * rsqrt(sum(x^2)) along the feature (last) dim.
    # rsqrt runs on the EUP slot; eps avoids NaN for an all-zero row (e.g. padding).
    inv = jax.lax.rsqrt(jnp.sum(e * e, axis=-1, keepdims=True) + 1e-12)
    o_ref[...] = (e * inv).astype(o_ref.dtype)


def _round_up(n, m):
    return ((n + m - 1) // m) * m


def mlp_embedding_forward(x, params, *, block_b=256):
    """x: [B, F] float32. params: dict with BN-folded weights/shifts."""
    B, F = x.shape
    H1 = params["w1"].shape[1]
    H2 = params["w2"].shape[1]
    E = params["w3"].shape[1]

    # Batch tile: multiple of 8 sublanes, capped at block_b; pad B up to a
    # whole number of tiles (padded rows are zeros and are sliced off below).
    TB = min(_round_up(block_b, 8), _round_up(B, 8))
    B_pad = _round_up(B, TB)
    if B_pad != B:
        x = jnp.pad(x, ((0, B_pad - B), (0, 0)))
    nb = B_pad // TB

    # Weights / shifts: constant index_map -> VMEM-resident across the grid.
    const = lambda shape: pl.BlockSpec(shape, lambda i: (0, 0))

    out = pl.pallas_call(
        mlp_embedding_kernel,
        out_shape=jax.ShapeDtypeStruct((B_pad, E), jnp.float32),
        grid=(nb,),
        in_specs=[
            pl.BlockSpec((TB, F), lambda i: (i, 0)),
            const((F, H1)), const((1, H1)),
            const((H1, H2)), const((1, H2)),
            const((H2, E)),
        ],
        out_specs=pl.BlockSpec((TB, E), lambda i: (i, 0)),
        compiler_params=pltpu.CompilerParams(
            dimension_semantics=("parallel",)),
    )(x, params["w1"], params["b1"], params["w2"], params["b2"], params["w3"])
    return out[:B]


def fold_bn_into_weight(w, bias, gamma, beta, running_mean, running_var, eps=1e-5):
    """Fold eval-mode BatchNorm1d (and the Linear bias) into the weight matrix
    and a per-channel shift:  BN(x @ w + b) == x @ (w * scale) + shift."""
    scale = gamma / jnp.sqrt(running_var + eps)
    w_folded = w * scale[None, :]
    shift = (bias - running_mean) * scale + beta
    return w_folded, shift[None, :]


def make_params(key, in_dim, hidden, emb_dim):
    """Returns (raw_params, folded_params). raw_params keep Linear + BN
    separate (used by the reference); folded_params feed the kernel."""
    h1, h2 = hidden
    ks = jax.random.split(key, 10)
    # Linear weights stored [in, out]; kaiming-ish scale for determinism.
    w1 = jax.random.normal(ks[0], (in_dim, h1), jnp.float32) * (1.0 / jnp.sqrt(in_dim))
    b1 = jax.random.normal(ks[1], (h1,), jnp.float32) * 0.1
    w2 = jax.random.normal(ks[2], (h1, h2), jnp.float32) * (1.0 / jnp.sqrt(h1))
    b2 = jax.random.normal(ks[3], (h2,), jnp.float32) * 0.1
    w3 = jax.random.normal(ks[4], (h2, emb_dim), jnp.float32) * (1.0 / jnp.sqrt(h2))
    # BatchNorm params (eval mode, nontrivial running stats)
    g1 = 1.0 + 0.1 * jax.random.normal(ks[5], (h1,), jnp.float32)
    be1 = 0.1 * jax.random.normal(ks[6], (h1,), jnp.float32)
    rm1 = 0.05 * jax.random.normal(ks[7], (h1,), jnp.float32)
    rv1 = jnp.abs(1.0 + 0.1 * jax.random.normal(ks[8], (h1,), jnp.float32))
    g2 = jnp.ones((h2,), jnp.float32)
    be2 = jnp.zeros((h2,), jnp.float32)
    rm2 = 0.05 * jax.random.normal(ks[9], (h2,), jnp.float32)
    rv2 = jnp.ones((h2,), jnp.float32)

    raw = dict(w1=w1, b1=b1, g1=g1, be1=be1, rm1=rm1, rv1=rv1,
               w2=w2, b2=b2, g2=g2, be2=be2, rm2=rm2, rv2=rv2, w3=w3)

    w1f, sh1 = fold_bn_into_weight(w1, b1, g1, be1, rm1, rv1)
    w2f, sh2 = fold_bn_into_weight(w2, b2, g2, be2, rm2, rv2)
    folded = {"w1": w1f, "b1": sh1, "w2": w2f, "b2": sh2, "w3": w3}
    return raw, folded


def reference_forward(x, raw, eps=1e-5):
    """Pure-JAX reference mirroring the PyTorch module (Linear + BN explicit)."""
    def bn(h, g, be, rm, rv):
        return (h - rm) / jnp.sqrt(rv + eps) * g + be
    h = x @ raw["w1"] + raw["b1"]
    h = jnp.maximum(bn(h, raw["g1"], raw["be1"], raw["rm1"], raw["rv1"]), 0.0)
    h = h @ raw["w2"] + raw["b2"]
    h = jnp.maximum(bn(h, raw["g2"], raw["be2"], raw["rm2"], raw["rv2"]), 0.0)
    e = h @ raw["w3"]
    return e / jnp.linalg.norm(e, ord=2, axis=-1, keepdims=True)


if __name__ == "__main__":
    # Module config: input_shape=[32], out_chans_per_layer=[64, 32],
    # embedding_dim=16, embedding_norm_ord=2, use_batch_norm=True.
    F = 32
    HIDDEN = (64, 32)
    EMB = 16

    key = jax.random.PRNGKey(0)
    kx1, kx2, kp = jax.random.split(key, 3)
    raw, folded = make_params(kp, F, HIDDEN, EMB)

    # Test 1: tiny batch (single grid tile).
    x1 = jax.random.normal(kx1, (8, F), jnp.float32)
    out1 = jax.block_until_ready(mlp_embedding_forward(x1, folded))
    ref1 = reference_forward(x1, raw)
    assert out1.shape == (8, EMB)
    assert jnp.allclose(out1, ref1, atol=1e-4, rtol=1e-4), "mismatch vs JAX reference (B=8)"

    # Test 2: non-multiple batch exercising the padded, multi-tile batch grid.
    x2 = jax.random.normal(kx2, (200, F), jnp.float32)
    out2 = jax.block_until_ready(mlp_embedding_forward(x2, folded, block_b=64))
    ref2 = reference_forward(x2, raw)
    assert out2.shape == (200, EMB)
    assert jnp.allclose(out2, ref2, atol=1e-4, rtol=1e-4), "mismatch vs JAX reference (B=200)"

    print("KERNEL_OK")
</pallas_src>

<mosaic_0001>
module attributes {stable_mosaic.version = 11 : i64} {
  func.func @mlp_embedding_kernel(%arg0: i32, %arg1: memref<8x32xf32, #tpu.memory_space<vmem>>, %arg2: memref<32x64xf32, #tpu.memory_space<vmem>>, %arg3: memref<1x64xf32, #tpu.memory_space<vmem>>, %arg4: memref<64x32xf32, #tpu.memory_space<vmem>>, %arg5: memref<1x32xf32, #tpu.memory_space<vmem>>, %arg6: memref<32x16xf32, #tpu.memory_space<vmem>>, %arg7: memref<8x16xf32, #tpu.memory_space<vmem>>) attributes {dimension_semantics = [#tpu.dimension_semantics<parallel>], iteration_bounds = array<i64: 1>, scalar_prefetch = 0 : i64, scratch_operands = 0 : i64, tpu.core_type = #tpu.core_type<tc>, window_params = [{transform_indices = @transform_0, window_bounds = array<i64: 8, 32>}, {pipeline_mode = #tpu.pipeline_mode<synchronous>, transform_indices = @transform_1, window_bounds = array<i64: 32, 64>}, {pipeline_mode = #tpu.pipeline_mode<synchronous>, transform_indices = @transform_2, window_bounds = array<i64: 1, 64>}, {pipeline_mode = #tpu.pipeline_mode<synchronous>, transform_indices = @transform_3, window_bounds = array<i64: 64, 32>}, {pipeline_mode = #tpu.pipeline_mode<synchronous>, transform_indices = @transform_4, window_bounds = array<i64: 1, 32>}, {pipeline_mode = #tpu.pipeline_mode<synchronous>, transform_indices = @transform_5, window_bounds = array<i64: 32, 16>}, {transform_indices = @transform_6, window_bounds = array<i64: 8, 16>}]} {
    %c0 = arith.constant 0 : index
    %c0_0 = arith.constant 0 : index
    %0 = vector.load %arg1[%c0, %c0_0] : memref<8x32xf32, #tpu.memory_space<vmem>>, vector<8x32xf32>
    %c0_1 = arith.constant 0 : index
    %c0_2 = arith.constant 0 : index
    %1 = vector.load %arg2[%c0_1, %c0_2] : memref<32x64xf32, #tpu.memory_space<vmem>>, vector<32x64xf32>
    %cst = arith.constant dense<0.000000e+00> : vector<8x64xf32>
    %2 = tpu.matmul %0, %1, %cst {dimension_numbers = #tpu.dot_dimension_numbers<[1], [0], [0], [1], [0, 0, 1, 1], [], []>} : vector<8x32xf32>, vector<32x64xf32>, vector<8x64xf32> -> vector<8x64xf32>
    %c0_3 = arith.constant 0 : index
    %c0_4 = arith.constant 0 : index
    %3 = vector.load %arg3[%c0_3, %c0_4] : memref<1x64xf32, #tpu.memory_space<vmem>>, vector<1x64xf32>
    %4 = vector.broadcast %3 : vector<1x64xf32> to vector<8x64xf32>
    %5 = arith.addf %2, %4 : vector<8x64xf32>
    %cst_5 = arith.constant 0.000000e+00 : f32
    %6 = vector.broadcast %cst_5 : f32 to vector<8x64xf32>
    %7 = arith.maximumf %5, %6 : vector<8x64xf32>
    %c0_6 = arith.constant 0 : index
    %c0_7 = arith.constant 0 : index
    %8 = vector.load %arg4[%c0_6, %c0_7] : memref<64x32xf32, #tpu.memory_space<vmem>>, vector<64x32xf32>
    %cst_8 = arith.constant dense<0.000000e+00> : vector<8x32xf32>
    %9 = tpu.matmul %7, %8, %cst_8 {dimension_numbers = #tpu.dot_dimension_numbers<[1], [0], [0], [1], [0, 0, 1, 1], [], []>} : vector<8x64xf32>, vector<64x32xf32>, vector<8x32xf32> -> vector<8x32xf32>
    %c0_9 = arith.constant 0 : index
    %c0_10 = arith.constant 0 : index
    %10 = vector.load %arg5[%c0_9, %c0_10] : memref<1x32xf32, #tpu.memory_space<vmem>>, vector<1x32xf32>
    %11 = vector.broadcast %10 : vector<1x32xf32> to vector<8x32xf32>
    %12 = arith.addf %9, %11 : vector<8x32xf32>
    %cst_11 = arith.constant 0.000000e+00 : f32
    %13 = vector.broadcast %cst_11 : f32 to vector<8x32xf32>
    %14 = arith.maximumf %12, %13 : vector<8x32xf32>
    %c0_12 = arith.constant 0 : index
    %c0_13 = arith.constant 0 : index
    %15 = vector.load %arg6[%c0_12, %c0_13] : memref<32x16xf32, #tpu.memory_space<vmem>>, vector<32x16xf32>
    %cst_14 = arith.constant dense<0.000000e+00> : vector<8x16xf32>
    %16 = tpu.matmul %14, %15, %cst_14 {dimension_numbers = #tpu.dot_dimension_numbers<[1], [0], [0], [1], [0, 0, 1, 1], [], []>} : vector<8x32xf32>, vector<32x16xf32>, vector<8x16xf32> -> vector<8x16xf32>
    %17 = arith.mulf %16, %16 : vector<8x16xf32>
    %cst_15 = arith.constant dense<0.000000e+00> : vector<8xf32>
    %18 = vector.multi_reduction <add>, %17, %cst_15 [1] : vector<8x16xf32> to vector<8xf32>
    %19 = vector.shape_cast %18 : vector<8xf32> to vector<8x1xf32>
    %cst_16 = arith.constant 9.99999996E-13 : f32
    %20 = vector.broadcast %cst_16 : f32 to vector<8x1xf32>
    %21 = arith.addf %19, %20 : vector<8x1xf32>
    %22 = math.rsqrt %21 : vector<8x1xf32>
    %23 = vector.broadcast %22 : vector<8x1xf32> to vector<8x16xf32>
    %24 = arith.mulf %16, %23 : vector<8x16xf32>
    %c0_17 = arith.constant 0 : index
    %c0_18 = arith.constant 0 : index
    %25 = vector.load %arg7[%c0_17, %c0_18] : memref<8x16xf32, #tpu.memory_space<vmem>>, vector<8x16xf32>
    tpu.vector_store %arg7[%c0_17, %c0_18], %24 {strides = array<i32>} : memref<8x16xf32, #tpu.memory_space<vmem>>, vector<8x16xf32>,
    return
  }
  func.func @transform_0(%arg0: i32) -> (i32, i32) {
    %c0_i32 = arith.constant 0 : i32
    %c0_i32_0 = arith.constant 0 : i32
    return %arg0, %c0_i32 : i32, i32
  }
  func.func @transform_1(%arg0: i32) -> (i32, i32) {
    %c0_i32 = arith.constant 0 : i32
    %c0_i32_0 = arith.constant 0 : i32
    %c0_i32_1 = arith.constant 0 : i32
    return %c0_i32, %c0_i32_0 : i32, i32
  }
  func.func @transform_2(%arg0: i32) -> (i32, i32) {
    %c0_i32 = arith.constant 0 : i32
    %c0_i32_0 = arith.constant 0 : i32
    %c0_i32_1 = arith.constant 0 : i32
    return %c0_i32, %c0_i32_0 : i32, i32
  }
  func.func @transform_3(%arg0: i32) -> (i32, i32) {
    %c0_i32 = arith.constant 0 : i32
    %c0_i32_0 = arith.constant 0 : i32
    %c0_i32_1 = arith.constant 0 : i32
    return %c0_i32, %c0_i32_0 : i32, i32
  }
  func.func @transform_4(%arg0: i32) -> (i32, i32) {
    %c0_i32 = arith.constant 0 : i32
    %c0_i32_0 = arith.constant 0 : i32
    %c0_i32_1 = arith.constant 0 : i32
    return %c0_i32, %c0_i32_0 : i32, i32
  }
  func.func @transform_5(%arg0: i32) -> (i32, i32) {
    %c0_i32 = arith.constant 0 : i32
    %c0_i32_0 = arith.constant 0 : i32
    %c0_i32_1 = arith.constant 0 : i32
    return %c0_i32, %c0_i32_0 : i32, i32
  }
  func.func @transform_6(%arg0: i32) -> (i32, i32) {
    %c0_i32 = arith.constant 0 : i32
    %c0_i32_0 = arith.constant 0 : i32
    return %arg0, %c0_i32 : i32, i32
  }
}

</mosaic_0001>

<bundles_post_ra>
// kernel: tpu_custom_call.1
= control target key start
LH: loop header
LB: loop body
LE: loop exit
PB: predicated region body
PF: predicated region fallthrough
CT: control target
= control target key end

     0   :  { %s290_s0 = inlined_call_operand.vmem [shape: f32[8,32], index: 0, kind: input, shape index: {}]   ;;  %s291_s1 = inlined_call_operand.vmem [shape: f32[32,64], index: 1, kind: input, shape index: {}]   ;;  %s292_s2 = inlined_call_operand.vmem [shape: f32[1,64], index: 2, kind: input, shape index: {}]   ;;  %s293_s3 = inlined_call_operand.vmem [shape: f32[64,32], index: 3, kind: input, shape index: {}]   ;;  %s294_s4 = inlined_call_operand.vmem [shape: f32[1,32], index: 4, kind: input, shape index: {}]   ;;  %s295_s5 = inlined_call_operand.vmem [shape: f32[32,16], index: 5, kind: input, shape index: {}]   ;;  %s296_s6 = inlined_call_operand.hbm [shape: f32[8,16], index: 6, kind: output, shape index: {}]  }
   0x1   :  { %v28_v0 = vld [vmem:[%s291_s1 + $0x18] sm:$0xff]  ;;  %v27_v1 = vld [vmem:[%s291_s1 + $0x10] sm:$0xff]  ;;  %v26_v3 = vld [vmem:[%s291_s1 + $0x8] sm:$0xff] }
   0x2   :  { %49 = vmatpush.msra.mxu0 %v28_v0  ;;  %v65_v2 = vld [vmem:[%s293_s3 + $0x38] sm:$0xff]  ;;  %v64_v4 = vld [vmem:[%s293_s3 + $0x30] sm:$0xff]  ;;  %v63_v5 = vld [vmem:[%s293_s3 + $0x28] sm:$0xff] }
   0x3   :  { %82 = vmatpush.msra.mxu1 %v65_v2  ;;  %v25_v6 = vld [vmem:[%s291_s1] sm:$0xff] }
   0x4   :  { %50 = vmatpush.msra.mxu0 %v27_v1 }
   0x5   :  { %83 = vmatpush.msra.mxu1 %v64_v4 }
   0x6   :  { %11 = vsyncpa [#allocation3], 0  ;;  %51 = vmatpush.msra.mxu0 %v26_v3  ;;  %v24_v7 = vld [vmem:[%s290_s0] sm:$0xff]  ;;  %vm33_vm0 = vcmask 261120   ;;  %v61_v9 = vld [vmem:[%s293_s3 + $0x18] sm:$0xff]  ;;  %vm70_vm1 = vcmask 523264  }
   0x7   :  { %v62_v8 = vld [vmem:[%s293_s3 + $0x20] sm:$0xff]  ;;  %84 = vmatpush.msra.mxu1 %v63_v5  ;;  %v60_v10 = vld [vmem:[%s293_s3 + $0x10] sm:$0xff]  ;;  %v59_v11 = vld [vmem:[%s293_s3 + $0x8] sm:$0xff]  ;;  %vm123_vm2 = vcmask 130048   ;;  %s147_s9 = sshll.u32 %s296_s6, 4  ;;  %s148_s9 = int_to_ptr.hbm [resolvable:$true] %s147_s9 }
   0x8   :  { %52 = vmatpush.msra.mxu0 %v25_v6  ;;  %v58_v12 = vld [vmem:[%s293_s3] sm:$0xff]  ;;  %v98_v13 = vld [vmem:[%s295_s5 + $0x18] sm:$0xff]  ;;  %v97_v18 = vld [vmem:[%s295_s5 + $0x10] sm:$0xff] }
   0x9   :  { %156 = vmatmul.msk.f32.vlgmr.msra.gmra.mxu0 %vm33_vm0, %v24_v7  ;;  %85 = vmatpush.msra.mxu1 %v62_v8  ;;  %v160_v14 = vld [vmem:[%s292_s2] ss:$0 sm:$0xff]  ;;  %v96_v19 = vld [vmem:[%s295_s5 + $0x8] sm:$0xff] }
   0xa   :  { %114 = vmatpush.msra.mxu2 %v98_v13  ;;  %v95_v20 = vld [vmem:[%s295_s5] sm:$0xff] }
   0xb   :  { %86 = vmatpush.msra.mxu1 %v61_v9  ;;  %v161_v21 = vld [vmem:[%s294_s4] ss:$0 sm:$0xff]  ;;  %s190_s4 = smov [#allocation2]  }
   0xc   :  { %115 = vmatpush.msra.mxu2 %v97_v18  ;;  %s145_s5 = sshll.u32 %s190_s4, 4  ;;  %s146_s5 = int_to_ptr.vmem [resolvable:$true] %s145_s5 }
   0xd   :  { %87 = vmatpush.msra.mxu1 %v60_v10 }
   0xe   :  { %116 = vmatpush.msra.mxu2 %v96_v19 }
   0xf   :  { %88 = vmatpush.msra.mxu1 %v59_v11 }
  0x10   :  { %117 = vmatpush.msra.mxu2 %v95_v20 }
  0x11   :  { %89 = vmatpush.msra.mxu1 %v58_v12 }
  0x86   :  { %v54_v15 = vpop.f32.mrf.mxu0 }
  0x87   :  { %v55_v16 = vadd.f32 %v160_v14, %v54_v15 }
  0x89   :  { %v57_v17 = vmax.f32 %v55_v16, 0.0 }
  0x8b   :  { %157 = vmatmul.msk.f32.vlgmr.msra.gmra.mxu1 %vm70_vm1, %v57_v17 }
 0x108   :  { %v91_v22 = vpop.f32.mrf.mxu1 }
 0x109   :  { %v92_v23 = vadd.f32 %v161_v21, %v91_v22 }
 0x10b   :  { %v94_v24 = vmax.f32 %v92_v23, 0.0 }
 0x10d   :  { %158 = vmatmul.msk.f32.vlgmr.msra.gmra.mxu2 %vm33_vm0, %v94_v24 }
 0x190   :  { %v119_v25 = vpop.f32.mrf.mxu2 }
 0x191   :  { %v122_v26 = vmul.f32 %v119_v25, %v119_v25 }
 0x193   :  { %v124_v27 = vsel %vm123_vm2, %v122_v26, 0.0 }
 0x194   :  { %125 = vadd.xlane.f32.xlu0 %v124_v27 }
 0x207   :  { %v126_v28 = vpop.xlane.xlu0 %125 }
 0x208   :  { %v127_v29 = vadd.f32 1e-12, %v126_v28 }
 0x20a   :  { %162 = vrsqrt.f32 %v127_v29  ;;  %vm134_vm4 = vweird.f32 %v127_v29 }
 0x210   :  { %v163_v30 = vpop.eup %162 }
 0x211   :  { %v129_v31 = vmul.f32 %v163_v30, %v127_v29  ;;  %vm135_vm3 = vweird.f32 %v163_v30 }
 0x212   :  { %vm136_vm5 = vmor %vm134_vm4, %vm135_vm3 }
 0x213   :  { %v130_v32 = vmul.f32 %v163_v30, %v129_v31 }
 0x215   :  { %v131_v33 = vmul.f32 0.5, %v130_v32 }
 0x217   :  { %v132_v34 = vsub.f32 1.5, %v131_v33 }
 0x219   :  { %v133_v35 = vmul.f32 %v163_v30, %v132_v34 }
 0x21b   :  { %v137_v36 = vsel %vm136_vm5, %v163_v30, %v133_v35 }
 0x21c   :  { %v138_v37 = vmul.f32 %v137_v36, %v119_v25 }
 0x21e   :  { %139 = vst.msk [vmem:[#allocation2] sm:$0xff] %vm123_vm2, %v138_v37 }
 0x21f   :  { %150 = dma.vmem_to_hbm [thread:$0]  %s146_s5, 128, %s148_s9, [#allocation3]  }
 0x220   :  { %188 = dma.done.wait [#allocation3], 128  }
 0x221   :  { %189 = vsyncadd [#allocation3], 4294967168 }
 0x222   :  { %155 = vsyncpa [#allocation3], 1 }

</bundles_post_ra>
